<compile_context>
chip_gen: v7x
topology: tpu7x:2x2x1
jax: 0.10.0
libtpu: 0.0.40
codegen_flags: <defaults>
</compile_context>

<pallas_src>
import jax
import jax.numpy as jnp
from jax.experimental import pallas as pl
from jax.experimental.pallas import tpu as pltpu

LANE = 128     # TPU lane width (last dim)
SUBLANE = 8    # f32 sublane tile (second-to-last dim)
TM_MAX = 512   # max batch-tile rows (mem-bound sweet spot; multiple of 256)


def _round_up(n, m):
    return ((n + m - 1) // m) * m


def dqnet_kernel(x_ref, w1_ref, b1_ref, w2_ref, b2_ref, o_ref):
    # x_ref:  (TM, E)  f32    w1_ref: (E, Hp) bf16   b1_ref: (1, Hp) f32
    # w2_ref: (Hp, O)  bf16   b2_ref: (1, O)  f32    o_ref:  (TM, O) f32
    x = x_ref[...].astype(jnp.bfloat16)                      # cast in vregs
    h = jnp.dot(x, w1_ref[...],
                preferred_element_type=jnp.float32) + b1_ref[...]
    h = jnp.maximum(h, 0.0)                                  # ReLU (f32, VPU)
    y = jnp.dot(h.astype(jnp.bfloat16), w2_ref[...],
                preferred_element_type=jnp.float32) + b2_ref[...]
    o_ref[...] = jnp.maximum(y, 0.0)                         # natural-O f32 store


def init_params(key, emb_size, hidden_size, out_size):
    """Deterministic init mimicking torch.nn.Linear's U(-1/sqrt(fan_in), ...).

    Weights stored pre-transposed as (in, out); biases as (1, out)."""
    k1, k2, k3, k4 = jax.random.split(key, 4)
    bound1 = 1.0 / (emb_size ** 0.5)
    bound2 = 1.0 / (hidden_size ** 0.5)
    w1 = jax.random.uniform(k1, (emb_size, hidden_size), jnp.float32,
                            -bound1, bound1)
    b1 = jax.random.uniform(k2, (1, hidden_size), jnp.float32, -bound1, bound1)
    w2 = jax.random.uniform(k3, (hidden_size, out_size), jnp.float32,
                            -bound2, bound2)
    b2 = jax.random.uniform(k4, (1, out_size), jnp.float32, -bound2, bound2)
    return w1, b1, w2, b2


def prepare_params(w1, b1, w2, b2):
    """One-time setup: pad only the hidden dim H to a 128 multiple, cast the
    weights to bf16 (biases stay f32).  E and O keep their natural sizes.
    Padded hidden lanes get zero weights+bias so they stay exactly zero
    through ReLU and contribute nothing downstream."""
    E, H = w1.shape
    O = w2.shape[1]
    Hp = _round_up(H, LANE)
    w1p = jnp.zeros((E, Hp), jnp.bfloat16).at[:, :H].set(w1.astype(jnp.bfloat16))
    b1p = jnp.zeros((1, Hp), jnp.float32).at[:, :H].set(b1.reshape(1, H))
    w2p = jnp.zeros((Hp, O), jnp.bfloat16).at[:H, :].set(w2.astype(jnp.bfloat16))
    b2p = b2.reshape(1, O).astype(jnp.float32)
    return w1p, b1p, w2p, b2p


def _choose_tm(B):
    """Batch tile: <=512 rows, >=2 grid steps for mid/large batches (so v7x's
    second TensorCore gets work), 16-row multiples when split, 8 otherwise."""
    if B >= 2 * TM_MAX:
        return TM_MAX
    if B > 16:
        return min(_round_up((B + 1) // 2, 16), TM_MAX)
    return _round_up(max(B, 1), SUBLANE)


@jax.jit
def dqnet_forward(x, w1p, b1p, w2p, b2p):
    """x: (B, 1, E) or (B, E) float32.  Returns (B, out_size) float32."""
    # Mirror x.squeeze() without the all-unit-dims hazard: layout-free reshape.
    if x.ndim == 3:
        x = x.reshape(x.shape[0], x.shape[-1])
    B, E = x.shape
    Ew, Hp = w1p.shape
    O = w2p.shape[1]
    assert E == Ew, "input feature dim must match fc1"

    TM = _choose_tm(B)
    Bp = _round_up(B, TM)
    if Bp != B:
        # Row-only pad of natural-width f32 x (cheap; usually not needed).
        x = jnp.pad(x, ((0, Bp - B), (0, 0)))

    flops = 2 * Bp * (E * Hp + Hp * O)
    bytes_accessed = (Bp * E * 4 + w1p.size * 2 + w2p.size * 2
                      + b1p.size * 4 + b2p.size * 4 + Bp * O * 4)

    out = pl.pallas_call(
        dqnet_kernel,
        out_shape=jax.ShapeDtypeStruct((Bp, O), jnp.float32),
        grid_spec=pl.GridSpec(
            grid=(Bp // TM,),
            in_specs=[
                pl.BlockSpec((TM, E), lambda i: (i, 0)),   # x tile per step (f32, natural E)
                pl.BlockSpec((E, Hp), lambda i: (0, 0)),   # w1 resident
                pl.BlockSpec((1, Hp), lambda i: (0, 0)),   # b1 resident
                pl.BlockSpec((Hp, O), lambda i: (0, 0)),   # w2 resident
                pl.BlockSpec((1, O), lambda i: (0, 0)),    # b2 resident
            ],
            out_specs=pl.BlockSpec((TM, O), lambda i: (i, 0)),
        ),
        compiler_params=pltpu.CompilerParams(
            dimension_semantics=("parallel",)),             # v7x: 2 TCs shard batch
        cost_estimate=pl.CostEstimate(
            flops=flops, transcendentals=0, bytes_accessed=bytes_accessed),
    )(x, w1p, b1p, w2p, b2p)

    # Only the (rare) batch-row padding needs slicing away; lanes are natural.
    return out if Bp == B else out[:B]


if __name__ == "__main__":
    emb_size, hidden_size, out_size = 32, 64, 16
    batch = 8

    key = jax.random.PRNGKey(0)
    kx, kp = jax.random.split(key)
    # Input with a singleton dim, as implied by x.squeeze() in the module.
    x = jax.random.normal(kx, (batch, 1, emb_size), dtype=jnp.float32)
    w1, b1, w2, b2 = init_params(kp, emb_size, hidden_size, out_size)
    w1p, b1p, w2p, b2p = prepare_params(w1, b1, w2, b2)

    out = dqnet_forward(x, w1p, b1p, w2p, b2p)
    out = jax.block_until_ready(out)
    assert out.shape == (batch, out_size)
    assert out.dtype == jnp.float32

    # Reference mirroring the kernel's bf16-matmul / f32-accumulate path.
    xs = x.reshape(batch, emb_size)
    h_ref = jnp.maximum(
        jnp.dot(xs.astype(jnp.bfloat16), w1.astype(jnp.bfloat16),
                preferred_element_type=jnp.float32) + b1, 0.0)
    ref = jnp.maximum(
        jnp.dot(h_ref.astype(jnp.bfloat16), w2.astype(jnp.bfloat16),
                preferred_element_type=jnp.float32) + b2, 0.0)
    assert jnp.allclose(out, ref, atol=1e-3, rtol=1e-3)

    # Loose sanity check against the pure-f32 math (bounds the bf16 error).
    ref_f32 = jnp.maximum(jnp.maximum(xs @ w1 + b1, 0.0) @ w2 + b2, 0.0)
    assert jnp.allclose(out, ref_f32, atol=5e-2, rtol=5e-2)

    print("KERNEL_OK")
</pallas_src>

<mosaic_0001>
module attributes {stable_mosaic.version = 11 : i64} {
  func.func @dqnet_kernel(%arg0: i32, %arg1: memref<8x32xf32, #tpu.memory_space<vmem>>, %arg2: memref<32x128xbf16, #tpu.memory_space<vmem>>, %arg3: memref<1x128xf32, #tpu.memory_space<vmem>>, %arg4: memref<128x16xbf16, #tpu.memory_space<vmem>>, %arg5: memref<1x16xf32, #tpu.memory_space<vmem>>, %arg6: memref<8x16xf32, #tpu.memory_space<vmem>>) attributes {dimension_semantics = [#tpu.dimension_semantics<parallel>], iteration_bounds = array<i64: 1>, scalar_prefetch = 0 : i64, scratch_operands = 0 : i64, tpu.core_type = #tpu.core_type<tc>, window_params = [{transform_indices = @transform_0, window_bounds = array<i64: 8, 32>}, {pipeline_mode = #tpu.pipeline_mode<synchronous>, transform_indices = @transform_1, window_bounds = array<i64: 32, 128>}, {pipeline_mode = #tpu.pipeline_mode<synchronous>, transform_indices = @transform_2, window_bounds = array<i64: 1, 128>}, {pipeline_mode = #tpu.pipeline_mode<synchronous>, transform_indices = @transform_3, window_bounds = array<i64: 128, 16>}, {pipeline_mode = #tpu.pipeline_mode<synchronous>, transform_indices = @transform_4, window_bounds = array<i64: 1, 16>}, {transform_indices = @transform_5, window_bounds = array<i64: 8, 16>}]} {
    %c0 = arith.constant 0 : index
    %c0_0 = arith.constant 0 : index
    %0 = vector.load %arg1[%c0, %c0_0] : memref<8x32xf32, #tpu.memory_space<vmem>>, vector<8x32xf32>
    %1 = arith.truncf %0 : vector<8x32xf32> to vector<8x32xbf16>
    %c0_1 = arith.constant 0 : index
    %c0_2 = arith.constant 0 : index
    %2 = vector.load %arg2[%c0_1, %c0_2] : memref<32x128xbf16, #tpu.memory_space<vmem>>, vector<32x128xbf16>
    %cst = arith.constant dense<0.000000e+00> : vector<8x128xf32>
    %3 = tpu.matmul %1, %2, %cst {dimension_numbers = #tpu.dot_dimension_numbers<[1], [0], [0], [1], [0, 0, 1, 1], [], []>} : vector<8x32xbf16>, vector<32x128xbf16>, vector<8x128xf32> -> vector<8x128xf32>
    %c0_3 = arith.constant 0 : index
    %c0_4 = arith.constant 0 : index
    %4 = vector.load %arg3[%c0_3, %c0_4] : memref<1x128xf32, #tpu.memory_space<vmem>>, vector<1x128xf32>
    %5 = vector.broadcast %4 : vector<1x128xf32> to vector<8x128xf32>
    %6 = arith.addf %3, %5 : vector<8x128xf32>
    %cst_5 = arith.constant 0.000000e+00 : f32
    %7 = vector.broadcast %cst_5 : f32 to vector<8x128xf32>
    %8 = arith.maximumf %6, %7 : vector<8x128xf32>
    %9 = arith.truncf %8 : vector<8x128xf32> to vector<8x128xbf16>
    %c0_6 = arith.constant 0 : index
    %c0_7 = arith.constant 0 : index
    %10 = vector.load %arg4[%c0_6, %c0_7] : memref<128x16xbf16, #tpu.memory_space<vmem>>, vector<128x16xbf16>
    %cst_8 = arith.constant dense<0.000000e+00> : vector<8x16xf32>
    %11 = tpu.matmul %9, %10, %cst_8 {dimension_numbers = #tpu.dot_dimension_numbers<[1], [0], [0], [1], [0, 0, 1, 1], [], []>} : vector<8x128xbf16>, vector<128x16xbf16>, vector<8x16xf32> -> vector<8x16xf32>
    %c0_9 = arith.constant 0 : index
    %c0_10 = arith.constant 0 : index
    %12 = vector.load %arg5[%c0_9, %c0_10] : memref<1x16xf32, #tpu.memory_space<vmem>>, vector<1x16xf32>
    %13 = vector.broadcast %12 : vector<1x16xf32> to vector<8x16xf32>
    %14 = arith.addf %11, %13 : vector<8x16xf32>
    %cst_11 = arith.constant 0.000000e+00 : f32
    %15 = vector.broadcast %cst_11 : f32 to vector<8x16xf32>
    %16 = arith.maximumf %14, %15 : vector<8x16xf32>
    %c0_12 = arith.constant 0 : index
    %c0_13 = arith.constant 0 : index
    %17 = vector.load %arg6[%c0_12, %c0_13] : memref<8x16xf32, #tpu.memory_space<vmem>>, vector<8x16xf32>
    tpu.vector_store %arg6[%c0_12, %c0_13], %16 {strides = array<i32>} : memref<8x16xf32, #tpu.memory_space<vmem>>, vector<8x16xf32>,
    return
  }
  func.func @transform_0(%arg0: i32) -> (i32, i32) {
    %c0_i32 = arith.constant 0 : i32
    %c0_i32_0 = arith.constant 0 : i32
    return %arg0, %c0_i32 : i32, i32
  }
  func.func @transform_1(%arg0: i32) -> (i32, i32) {
    %c0_i32 = arith.constant 0 : i32
    %c0_i32_0 = arith.constant 0 : i32
    %c0_i32_1 = arith.constant 0 : i32
    return %c0_i32, %c0_i32_0 : i32, i32
  }
  func.func @transform_2(%arg0: i32) -> (i32, i32) {
    %c0_i32 = arith.constant 0 : i32
    %c0_i32_0 = arith.constant 0 : i32
    %c0_i32_1 = arith.constant 0 : i32
    return %c0_i32, %c0_i32_0 : i32, i32
  }
  func.func @transform_3(%arg0: i32) -> (i32, i32) {
    %c0_i32 = arith.constant 0 : i32
    %c0_i32_0 = arith.constant 0 : i32
    %c0_i32_1 = arith.constant 0 : i32
    return %c0_i32, %c0_i32_0 : i32, i32
  }
  func.func @transform_4(%arg0: i32) -> (i32, i32) {
    %c0_i32 = arith.constant 0 : i32
    %c0_i32_0 = arith.constant 0 : i32
    %c0_i32_1 = arith.constant 0 : i32
    return %c0_i32, %c0_i32_0 : i32, i32
  }
  func.func @transform_5(%arg0: i32) -> (i32, i32) {
    %c0_i32 = arith.constant 0 : i32
    %c0_i32_0 = arith.constant 0 : i32
    return %arg0, %c0_i32 : i32, i32
  }
}

</mosaic_0001>

<bundles_post_ra>
// kernel: dqnet_forward.1
= control target key start
LH: loop header
LB: loop body
LE: loop exit
PB: predicated region body
PF: predicated region fallthrough
CT: control target
= control target key end

     0   :  { %v311_v1 = vmov 0.0   ;;  %vm312_vm0 = vmmov 0   ;;  %vm47_vm1 = vcmask 261120   ;;  %s395_s0 = inlined_call_operand.vmem [shape: f32[8,32], index: 0, kind: input, shape index: {}]   ;;  %s396_s1 = inlined_call_operand.vmem [shape: bf16[32,128], index: 1, kind: input, shape index: {}]   ;;  %s397_s2 = inlined_call_operand.vmem [shape: f32[1,128], index: 2, kind: input, shape index: {}]   ;;  %s398_s3 = inlined_call_operand.vmem [shape: bf16[128,16], index: 3, kind: input, shape index: {}]   ;;  %s399_s4 = inlined_call_operand.vmem [shape: f32[1,16], index: 4, kind: input, shape index: {}]   ;;  %s400_s5 = inlined_call_operand.hbm [shape: f32[8,16], index: 5, kind: output, shape index: {}]  }
   0x1   :  { %v277_v0 = vld [vmem:[%s396_s1] sm:$0xff]   ;;  %246 = vmatprep.subr.bf16.mxu0 %v311_v1  ;;  %v278_v2 = vld [vmem:[%s396_s1 + $0x8] sm:$0xff]   ;;  %254 = vmatprep.subr.bf16.mxu1 %v311_v1  ;;  %v281_v7 = vld [vmem:[%s398_s3 + $0x10] sm:$0xff]  }
   0x2   :  { %247 = vmatpush3.bf16.msra.mxu0 %v277_v0  ;;  %250 = vmatprep.mubr.msk.bf16.mxu0 %vm312_vm0, %v311_v1  ;;  %v22_v3 = vld [vmem:[%s395_s0] sm:$0xff]  ;;  %v280_v6 = vld [vmem:[%s398_s3 + $0x8] sm:$0xff]  }
   0x3   :  { %248 = vmatprep.subr.bf16.mxu0 %v311_v1  ;;  %v279_v4 = vld [vmem:[%s398_s3] sm:$0xff]   ;;  %270 = vmatprep.mubr.msk.bf16.mxu1 %vm312_vm0, %v311_v1  ;;  %v23_v5 = vpack.c.bf16 %v22_v3, %v22_v3 }
   0x4   :  { %255 = vmatpush3.bf16.msra.mxu1 %v279_v4 }
   0x5   :  { %256 = vmatprep.subr.bf16.mxu1 %v311_v1 }
   0x6   :  { %249 = vmatpush3.bf16.msra.mxu0 %v278_v2 }
   0x8   :  { %257 = vmatpush3.bf16.msra.mxu1 %v280_v6 }
   0x9   :  { %251 = vmatmul.mubr.msk.bf16.vlgmr.msra.gmra.mrb[0].mxu0 %vm47_vm1, %v23_v5  ;;  %258 = vmatprep.subr.bf16.mxu1 %v311_v1 }
   0xa   :  { %10 = vsyncpa [#allocation3], 0  ;;  %v282_v8 = vld [vmem:[%s398_s3 + $0x18] sm:$0xff]   ;;  %v283_v9 = vld [vmem:[%s398_s3 + $0x20] sm:$0xff]   ;;  %s313_s17 = smov [#allocation2]   ;;  %vm205_vm2 = vcmask 130048  }
   0xb   :  { %v284_v10 = vld [vmem:[%s398_s3 + $0x28] sm:$0xff]   ;;  %v285_v11 = vld [vmem:[%s398_s3 + $0x30] sm:$0xff]   ;;  %v286_v12 = vld [vmem:[%s398_s3 + $0x38] sm:$0xff]   ;;  %s213_s3 = sshll.u32 %s313_s17, 4  ;;  %s214_s3 = int_to_ptr.vmem [resolvable:$true] %s213_s3 }
   0xc   :  { %259 = vmatpush3.bf16.msra.mxu1 %v281_v7  ;;  %v221_v13 = vld [vmem:[%s397_s2] ss:$0 sm:$0xff]  ;;  %s287_s2 = scalar_lea.vmem %s214_s3, 128  ;;  %p292_p1 = scmp.lt.s32.totalorder %s214_s3, %s214_s3 }
   0xd   :  { %260 = vmatprep.subr.bf16.mxu1 %v311_v1  ;;  %v225_v21 = vld [vmem:[%s399_s4] ss:$0 sm:$0xff]  ;;  %p288_p0 = scmp.ne.s32.totalorder %s214_s3, %s287_s2  ;;  %p293_p2 = scmp.lt.s32.totalorder %s287_s2, %s287_s2 }
   0xf   :  { %p294_p3 = por %p293_p2, %p292_p1 }
  0x10   :  { %261 = vmatpush3.bf16.msra.mxu1 %v282_v8 }
  0x11   :  { %262 = vmatprep.subr.bf16.mxu1 %v311_v1  ;;  %p295_p4 = pnand %p294_p3, %p288_p0 }
  0x14   :  { %263 = vmatpush3.bf16.msra.mxu1 %v283_v9 }
  0x15   :  { %264 = vmatprep.subr.bf16.mxu1 %v311_v1 }
  0x18   :  { %265 = vmatpush3.bf16.msra.mxu1 %v284_v10 }
  0x19   :  { %266 = vmatprep.subr.bf16.mxu1 %v311_v1 }
  0x1c   :  { %267 = vmatpush3.bf16.msra.mxu1 %v285_v11 }
  0x1d   :  { %268 = vmatprep.subr.bf16.mxu1 %v311_v1 }
  0x20   :  { %269 = vmatpush3.bf16.msra.mxu1 %v286_v12 }
  0xdc   :  { %v85_v14 = vpop.f32.mrb[0].mxu0 }
  0xdd   :  { %v86_v15 = vadd.f32 %v221_v13, %v85_v14  ;;  %v252_v16 = vpop.f32.mrb[1].mxu0 }
  0xde   :  { %v88_v17 = vpop.f32.mrb[2].mxu0 }
  0xdf   :  { %v91_v18 = vmax.f32 %v86_v15, 0.0  ;;  %v253_v19 = vpop.f32.mrb[3].mxu0 }
  0xe1   :  { %v92_v20 = vpack.c.bf16 %v91_v18, %v91_v18 }
  0xe3   :  { %271 = vmatmul.mubr.bf16.vlgmr.msra.gmra.mrb[0].mxu1 %v92_v20 }
 0x1b6   :  { %v198_v22 = vpop.f32.mrb[0].mxu1 }
 0x1b7   :  { %v199_v23 = vadd.f32 %v225_v21, %v198_v22  ;;  %v272_v24 = vpop.f32.mrb[1].mxu1 }
 0x1b8   :  { %v201_v25 = vpop.f32.mrb[2].mxu1 }
 0x1b9   :  { %v204_v26 = vmax.f32 %v199_v23, 0.0  ;;  %v273_v27 = vpop.f32.mrb[3].mxu1 }
 0x1bb   :  { %206 = vst.msk [vmem:[#allocation2] sm:$0xff] %vm205_vm2, %v204_v26 }
 0x1bc   :  { %298 = shalt.err (!%p295_p4)
}
 0x1bd   :  { %s299_s19 = scalar_lea.hbm %s400_s5, 128 }
 0x1be   :  { %p300_p5 = scmp.ne.s32.totalorder %s400_s5, %s299_s19  ;;  %p303_p6 = scmp.lt.u32.totalorder %s299_s19, %s400_s5 }
 0x1c0   :  { %p305_p7 = pnand %p303_p6, %p300_p5 }
 0x1c2   :  { %308 = shalt.err (!%p305_p7)
}
 0x1c3   :  { %216 = dma.vmem_to_hbm [thread:$0]  %s214_s3, 128, %s400_s5, [#allocation3]  }
 0x1c4   :  { %309 = dma.done.wait [#allocation3], 128  }
 0x1c5   :  { %310 = vsyncadd [#allocation3], 4294967168 }
 0x1c6   :  { %220 = vsyncpa [#allocation3], 1 }

</bundles_post_ra>
